<compile_context>
chip_gen: v6e
topology: v6e:2x2x1
jax: 0.10.0
libtpu: 0.0.40
codegen_flags: <defaults>
</compile_context>

<pallas_src>
import math
import functools

import jax
import jax.numpy as jnp
from jax.experimental import pallas as pl
from jax.experimental.pallas import tpu as pltpu


def _make_conv_kernel(C, H, W, KH, KW, pad, Wp, Mp, O):
    """Builds the per-image conv kernel (all sizes static Python ints)."""

    def kernel(x_ref, w_ref, b_ref, o_ref, xpad_s):
        # x_ref : (C, H*W)      one image, spatial dims flattened (free reshape)
        # w_ref : (O, C*KH*KW)  tap-major / channel-minor weights (resident)
        # b_ref : (O, 1)        bias (resident)
        # o_ref : (O, Mp)       Mp = Ho*Wp over-wide flat output
        # xpad_s: (C, L)        flattened zero-padded image + (KW-1) zero tail
        #
        # 1) zero-pad in VMEM (no jnp.pad HBM round-trip in the wrapper)
        xpad_s[...] = jnp.zeros_like(xpad_s)
        for h in range(H):                      # static, small unroll
            dst = (pad + h) * Wp + pad
            xpad_s[:, dst:dst + W] = x_ref[:, h * W:(h + 1) * W]

        # 2) per-tap accumulation: tap (kh,kw) is a contiguous flat window of
        #    length Ho*Wp starting at kh*Wp+kw (columns wo>=Wo are garbage and
        #    are discarded outside the kernel).
        acc = jnp.zeros((O, Mp), dtype=jnp.float32)
        for kh in range(KH):
            for kw in range(KW):
                base = (kh * KW + kw) * C
                s = kh * Wp + kw
                acc = acc + jnp.dot(
                    w_ref[:, base:base + C],            # (O, C)
                    xpad_s[:, s:s + Mp],                # (C, Mp)
                    preferred_element_type=jnp.float32)

        # 3) bias + store (lane-dense (O, Mp) block)
        o_ref[...] = (acc + b_ref[...]).astype(o_ref.dtype)

    return kernel


@functools.partial(jax.jit, static_argnames=("kernel_size",))
def conv2d_pallas(x_nchw, weight_oihw, bias_o, *, kernel_size):
    """Equivalent of Conv2D.forward(x): stride-1 conv, padding=k//2, bias.

    x_nchw:      (N, C, H, W)
    weight_oihw: (O, C, KH, KW)   (PyTorch layout)
    bias_o:      (O,)
    returns:     (N, O, Ho, Wo)   Ho = H + 2*(k//2) - k + 1  (matches torch)
    """
    N, C, H, W = x_nchw.shape
    O, Cw, KH, KW = weight_oihw.shape
    assert Cw == C and KH == kernel_size and KW == kernel_size
    pad = int(math.floor(kernel_size / 2))
    Hp, Wp = H + 2 * pad, W + 2 * pad
    Ho, Wo = Hp - KH + 1, Wp - KW + 1
    Mp = Ho * Wp                      # flat (over-wide) output length per image
    L = Hp * Wp + (KW - 1)            # flat padded image + tail so taps stay in-bounds
    K = C * KH * KW

    # Metadata-only reshape (contiguous), no HBM copy.
    x_flat = x_nchw.reshape(N, C, H * W)
    # Tiny weight relayout: (O,C,KH,KW) -> (O,KH,KW,C) -> (O,K); column
    # (kh*KW + kw)*C + c matches the kernel's tap/channel ordering.
    w2 = jnp.transpose(weight_oihw, (0, 2, 3, 1)).reshape(O, K)
    b2 = bias_o.reshape(O, 1)

    kernel = _make_conv_kernel(C, H, W, KH, KW, pad, Wp, Mp, O)

    out_flat = pl.pallas_call(
        kernel,
        out_shape=jax.ShapeDtypeStruct((N, O, Mp), x_nchw.dtype),
        grid_spec=pltpu.PrefetchScalarGridSpec(
            num_scalar_prefetch=0,
            grid=(N,),                                   # one image per step
            in_specs=[
                pl.BlockSpec((None, C, H * W), lambda n: (n, 0, 0)),  # input read once
                pl.BlockSpec((O, K), lambda n: (0, 0)),               # resident
                pl.BlockSpec((O, 1), lambda n: (0, 0)),               # resident
            ],
            out_specs=pl.BlockSpec((None, O, Mp), lambda n: (n, 0, 0)),
            scratch_shapes=[pltpu.VMEM((C, L), x_nchw.dtype)],
        ),
        compiler_params=pltpu.CompilerParams(
            dimension_semantics=("parallel",),           # independent images
        ),
    )(x_flat, w2, b2)

    # Free split-reshape, then drop the KW-1 garbage columns per row
    # (small, output-sized copy — the only wrapper post-op left).
    out = out_flat.reshape(N, O, Ho, Wp)
    if Wp != Wo:
        out = out[:, :, :, :Wo]
    return out


def init_conv2d_params(key, in_channels, kernel_size, last):
    """Deterministic init mirroring nn.Conv2d default (uniform ±1/sqrt(fan_in))."""
    out_channels = 1 if last else 5
    fan_in = in_channels * kernel_size * kernel_size
    bound = 1.0 / math.sqrt(fan_in)
    k_w, k_b = jax.random.split(key)
    weight = jax.random.uniform(
        k_w, (out_channels, in_channels, kernel_size, kernel_size),
        minval=-bound, maxval=bound, dtype=jnp.float32)
    bias = jax.random.uniform(
        k_b, (out_channels,), minval=-bound, maxval=bound, dtype=jnp.float32)
    return weight, bias


def _reference_conv(x_nchw, weight_oihw, bias_o, kernel_size):
    pad = int(math.floor(kernel_size / 2))
    out = jax.lax.conv_general_dilated(
        x_nchw, weight_oihw,
        window_strides=(1, 1),
        padding=((pad, pad), (pad, pad)),
        dimension_numbers=("NCHW", "OIHW", "NCHW"))
    return out + bias_o[None, :, None, None]


if __name__ == "__main__":
    key = jax.random.PRNGKey(0)
    k_x, k_p = jax.random.split(key)

    in_channels = 4
    kernel_size = 3
    N, H, W = 2, 16, 16

    x = jax.random.normal(k_x, (N, in_channels, H, W), dtype=jnp.float32)

    # last=False -> out_channels = 5
    weight, bias = init_conv2d_params(k_p, in_channels, kernel_size, False)
    out = jax.block_until_ready(conv2d_pallas(x, weight, bias, kernel_size=kernel_size))
    ref = _reference_conv(x, weight, bias, kernel_size)
    assert out.shape == (N, 5, H, W), out.shape
    assert jnp.allclose(out, ref, atol=1e-4, rtol=1e-4), float(jnp.max(jnp.abs(out - ref)))

    # last=True -> out_channels = 1
    w1, b1 = init_conv2d_params(k_p, in_channels, kernel_size, True)
    out1 = jax.block_until_ready(conv2d_pallas(x, w1, b1, kernel_size=kernel_size))
    ref1 = _reference_conv(x, w1, b1, kernel_size)
    assert out1.shape == (N, 1, H, W), out1.shape
    assert jnp.allclose(out1, ref1, atol=1e-4, rtol=1e-4)

    print("KERNEL_OK")
</pallas_src>

<mosaic_0001>
module attributes {stable_mosaic.version = 11 : i64} {
  func.func @kernel(%arg0: i32, %arg1: memref<1x4x256xf32, #tpu.memory_space<vmem>>, %arg2: memref<5x36xf32, #tpu.memory_space<vmem>>, %arg3: memref<5x1xf32, #tpu.memory_space<vmem>>, %arg4: memref<1x5x288xf32, #tpu.memory_space<vmem>>, %arg5: memref<4x326xf32, #tpu.memory_space<vmem>>) attributes {dimension_semantics = [#tpu.dimension_semantics<parallel>], iteration_bounds = array<i64: 2>, scalar_prefetch = 0 : i64, scratch_operands = 1 : i64, tpu.core_type = #tpu.core_type<tc>, window_params = [{transform_indices = @transform_0, window_bounds = array<i64: 1, 4, 256>}, {pipeline_mode = #tpu.pipeline_mode<synchronous>, transform_indices = @transform_1, window_bounds = array<i64: 5, 36>}, {pipeline_mode = #tpu.pipeline_mode<synchronous>, transform_indices = @transform_2, window_bounds = array<i64: 5, 1>}, {transform_indices = @transform_3, window_bounds = array<i64: 1, 5, 288>}]} {
    %cst = arith.constant 0.000000e+00 : f32
    %0 = vector.broadcast %cst : f32 to vector<4x326xf32>
    %c0 = arith.constant 0 : index
    %c0_0 = arith.constant 0 : index
    %1 = vector.load %arg5[%c0, %c0_0] : memref<4x326xf32, #tpu.memory_space<vmem>>, vector<4x326xf32>
    tpu.vector_store %arg5[%c0, %c0_0], %0 {strides = array<i32>} : memref<4x326xf32, #tpu.memory_space<vmem>>, vector<4x326xf32>,
    %c0_1 = arith.constant 0 : index
    %c0_2 = arith.constant 0 : index
    %c0_3 = arith.constant 0 : index
    %2 = vector.load %arg1[%c0_1, %c0_2, %c0_3] : memref<1x4x256xf32, #tpu.memory_space<vmem>>, vector<1x4x16xf32>
    %3 = vector.shape_cast %2 : vector<1x4x16xf32> to vector<4x16xf32>
    %c0_4 = arith.constant 0 : index
    %c19 = arith.constant 19 : index
    %4 = vector.load %arg5[%c0_4, %c19] : memref<4x326xf32, #tpu.memory_space<vmem>>, vector<4x16xf32>
    tpu.vector_store %arg5[%c0_4, %c19], %3 {strides = array<i32>} : memref<4x326xf32, #tpu.memory_space<vmem>>, vector<4x16xf32>,
    %c0_5 = arith.constant 0 : index
    %c0_6 = arith.constant 0 : index
    %c16 = arith.constant 16 : index
    %5 = vector.load %arg1[%c0_5, %c0_6, %c16] : memref<1x4x256xf32, #tpu.memory_space<vmem>>, vector<1x4x16xf32>
    %6 = vector.shape_cast %5 : vector<1x4x16xf32> to vector<4x16xf32>
    %c0_7 = arith.constant 0 : index
    %c37 = arith.constant 37 : index
    %7 = vector.load %arg5[%c0_7, %c37] : memref<4x326xf32, #tpu.memory_space<vmem>>, vector<4x16xf32>
    tpu.vector_store %arg5[%c0_7, %c37], %6 {strides = array<i32>} : memref<4x326xf32, #tpu.memory_space<vmem>>, vector<4x16xf32>,
    %c0_8 = arith.constant 0 : index
    %c0_9 = arith.constant 0 : index
    %c32 = arith.constant 32 : index
    %8 = vector.load %arg1[%c0_8, %c0_9, %c32] : memref<1x4x256xf32, #tpu.memory_space<vmem>>, vector<1x4x16xf32>
    %9 = vector.shape_cast %8 : vector<1x4x16xf32> to vector<4x16xf32>
    %c0_10 = arith.constant 0 : index
    %c55 = arith.constant 55 : index
    %10 = vector.load %arg5[%c0_10, %c55] : memref<4x326xf32, #tpu.memory_space<vmem>>, vector<4x16xf32>
    tpu.vector_store %arg5[%c0_10, %c55], %9 {strides = array<i32>} : memref<4x326xf32, #tpu.memory_space<vmem>>, vector<4x16xf32>,
    %c0_11 = arith.constant 0 : index
    %c0_12 = arith.constant 0 : index
    %c48 = arith.constant 48 : index
    %11 = vector.load %arg1[%c0_11, %c0_12, %c48] : memref<1x4x256xf32, #tpu.memory_space<vmem>>, vector<1x4x16xf32>
    %12 = vector.shape_cast %11 : vector<1x4x16xf32> to vector<4x16xf32>
    %c0_13 = arith.constant 0 : index
    %c73 = arith.constant 73 : index
    %13 = vector.load %arg5[%c0_13, %c73] : memref<4x326xf32, #tpu.memory_space<vmem>>, vector<4x16xf32>
    tpu.vector_store %arg5[%c0_13, %c73], %12 {strides = array<i32>} : memref<4x326xf32, #tpu.memory_space<vmem>>, vector<4x16xf32>,
    %c0_14 = arith.constant 0 : index
    %c0_15 = arith.constant 0 : index
    %c64 = arith.constant 64 : index
    %14 = vector.load %arg1[%c0_14, %c0_15, %c64] : memref<1x4x256xf32, #tpu.memory_space<vmem>>, vector<1x4x16xf32>
    %15 = vector.shape_cast %14 : vector<1x4x16xf32> to vector<4x16xf32>
    %c0_16 = arith.constant 0 : index
    %c91 = arith.constant 91 : index
    %16 = vector.load %arg5[%c0_16, %c91] : memref<4x326xf32, #tpu.memory_space<vmem>>, vector<4x16xf32>
    tpu.vector_store %arg5[%c0_16, %c91], %15 {strides = array<i32>} : memref<4x326xf32, #tpu.memory_space<vmem>>, vector<4x16xf32>,
    %c0_17 = arith.constant 0 : index
    %c0_18 = arith.constant 0 : index
    %c80 = arith.constant 80 : index
    %17 = vector.load %arg1[%c0_17, %c0_18, %c80] : memref<1x4x256xf32, #tpu.memory_space<vmem>>, vector<1x4x16xf32>
    %18 = vector.shape_cast %17 : vector<1x4x16xf32> to vector<4x16xf32>
    %c0_19 = arith.constant 0 : index
    %c109 = arith.constant 109 : index
    %19 = vector.load %arg5[%c0_19, %c109] : memref<4x326xf32, #tpu.memory_space<vmem>>, vector<4x16xf32>
    tpu.vector_store %arg5[%c0_19, %c109], %18 {strides = array<i32>} : memref<4x326xf32, #tpu.memory_space<vmem>>, vector<4x16xf32>,
    %c0_20 = arith.constant 0 : index
    %c0_21 = arith.constant 0 : index
    %c96 = arith.constant 96 : index
    %20 = vector.load %arg1[%c0_20, %c0_21, %c96] : memref<1x4x256xf32, #tpu.memory_space<vmem>>, vector<1x4x16xf32>
    %21 = vector.shape_cast %20 : vector<1x4x16xf32> to vector<4x16xf32>
    %c0_22 = arith.constant 0 : index
    %c127 = arith.constant 127 : index
    %22 = vector.load %arg5[%c0_22, %c127] : memref<4x326xf32, #tpu.memory_space<vmem>>, vector<4x16xf32>
    tpu.vector_store %arg5[%c0_22, %c127], %21 {strides = array<i32>} : memref<4x326xf32, #tpu.memory_space<vmem>>, vector<4x16xf32>,
    %c0_23 = arith.constant 0 : index
    %c0_24 = arith.constant 0 : index
    %c112 = arith.constant 112 : index
    %23 = vector.load %arg1[%c0_23, %c0_24, %c112] : memref<1x4x256xf32, #tpu.memory_space<vmem>>, vector<1x4x16xf32>
    %24 = vector.shape_cast %23 : vector<1x4x16xf32> to vector<4x16xf32>
    %c0_25 = arith.constant 0 : index
    %c145 = arith.constant 145 : index
    %25 = vector.load %arg5[%c0_25, %c145] : memref<4x326xf32, #tpu.memory_space<vmem>>, vector<4x16xf32>
    tpu.vector_store %arg5[%c0_25, %c145], %24 {strides = array<i32>} : memref<4x326xf32, #tpu.memory_space<vmem>>, vector<4x16xf32>,
    %c0_26 = arith.constant 0 : index
    %c0_27 = arith.constant 0 : index
    %c128 = arith.constant 128 : index
    %26 = vector.load %arg1[%c0_26, %c0_27, %c128] : memref<1x4x256xf32, #tpu.memory_space<vmem>>, vector<1x4x16xf32>
    %27 = vector.shape_cast %26 : vector<1x4x16xf32> to vector<4x16xf32>
    %c0_28 = arith.constant 0 : index
    %c163 = arith.constant 163 : index
    %28 = vector.load %arg5[%c0_28, %c163] : memref<4x326xf32, #tpu.memory_space<vmem>>, vector<4x16xf32>
    tpu.vector_store %arg5[%c0_28, %c163], %27 {strides = array<i32>} : memref<4x326xf32, #tpu.memory_space<vmem>>, vector<4x16xf32>,
    %c0_29 = arith.constant 0 : index
    %c0_30 = arith.constant 0 : index
    %c144 = arith.constant 144 : index
    %29 = vector.load %arg1[%c0_29, %c0_30, %c144] : memref<1x4x256xf32, #tpu.memory_space<vmem>>, vector<1x4x16xf32>
    %30 = vector.shape_cast %29 : vector<1x4x16xf32> to vector<4x16xf32>
    %c0_31 = arith.constant 0 : index
    %c181 = arith.constant 181 : index
    %31 = vector.load %arg5[%c0_31, %c181] : memref<4x326xf32, #tpu.memory_space<vmem>>, vector<4x16xf32>
    tpu.vector_store %arg5[%c0_31, %c181], %30 {strides = array<i32>} : memref<4x326xf32, #tpu.memory_space<vmem>>, vector<4x16xf32>,
    %c0_32 = arith.constant 0 : index
    %c0_33 = arith.constant 0 : index
    %c160 = arith.constant 160 : index
    %32 = vector.load %arg1[%c0_32, %c0_33, %c160] : memref<1x4x256xf32, #tpu.memory_space<vmem>>, vector<1x4x16xf32>
    %33 = vector.shape_cast %32 : vector<1x4x16xf32> to vector<4x16xf32>
    %c0_34 = arith.constant 0 : index
    %c199 = arith.constant 199 : index
    %34 = vector.load %arg5[%c0_34, %c199] : memref<4x326xf32, #tpu.memory_space<vmem>>, vector<4x16xf32>
    tpu.vector_store %arg5[%c0_34, %c199], %33 {strides = array<i32>} : memref<4x326xf32, #tpu.memory_space<vmem>>, vector<4x16xf32>,
    %c0_35 = arith.constant 0 : index
    %c0_36 = arith.constant 0 : index
    %c176 = arith.constant 176 : index
    %35 = vector.load %arg1[%c0_35, %c0_36, %c176] : memref<1x4x256xf32, #tpu.memory_space<vmem>>, vector<1x4x16xf32>
    %36 = vector.shape_cast %35 : vector<1x4x16xf32> to vector<4x16xf32>
    %c0_37 = arith.constant 0 : index
    %c217 = arith.constant 217 : index
    %37 = vector.load %arg5[%c0_37, %c217] : memref<4x326xf32, #tpu.memory_space<vmem>>, vector<4x16xf32>
    tpu.vector_store %arg5[%c0_37, %c217], %36 {strides = array<i32>} : memref<4x326xf32, #tpu.memory_space<vmem>>, vector<4x16xf32>,
    %c0_38 = arith.constant 0 : index
    %c0_39 = arith.constant 0 : index
    %c192 = arith.constant 192 : index
    %38 = vector.load %arg1[%c0_38, %c0_39, %c192] : memref<1x4x256xf32, #tpu.memory_space<vmem>>, vector<1x4x16xf32>
    %39 = vector.shape_cast %38 : vector<1x4x16xf32> to vector<4x16xf32>
    %c0_40 = arith.constant 0 : index
    %c235 = arith.constant 235 : index
    %40 = vector.load %arg5[%c0_40, %c235] : memref<4x326xf32, #tpu.memory_space<vmem>>, vector<4x16xf32>
    tpu.vector_store %arg5[%c0_40, %c235], %39 {strides = array<i32>} : memref<4x326xf32, #tpu.memory_space<vmem>>, vector<4x16xf32>,
    %c0_41 = arith.constant 0 : index
    %c0_42 = arith.constant 0 : index
    %c208 = arith.constant 208 : index
    %41 = vector.load %arg1[%c0_41, %c0_42, %c208] : memref<1x4x256xf32, #tpu.memory_space<vmem>>, vector<1x4x16xf32>
    %42 = vector.shape_cast %41 : vector<1x4x16xf32> to vector<4x16xf32>
    %c0_43 = arith.constant 0 : index
    %c253 = arith.constant 253 : index
    %43 = vector.load %arg5[%c0_43, %c253] : memref<4x326xf32, #tpu.memory_space<vmem>>, vector<4x16xf32>
    tpu.vector_store %arg5[%c0_43, %c253], %42 {strides = array<i32>} : memref<4x326xf32, #tpu.memory_space<vmem>>, vector<4x16xf32>,
    %c0_44 = arith.constant 0 : index
    %c0_45 = arith.constant 0 : index
    %c224 = arith.constant 224 : index
    %44 = vector.load %arg1[%c0_44, %c0_45, %c224] : memref<1x4x256xf32, #tpu.memory_space<vmem>>, vector<1x4x16xf32>
    %45 = vector.shape_cast %44 : vector<1x4x16xf32> to vector<4x16xf32>
    %c0_46 = arith.constant 0 : index
    %c271 = arith.constant 271 : index
    %46 = vector.load %arg5[%c0_46, %c271] : memref<4x326xf32, #tpu.memory_space<vmem>>, vector<4x16xf32>
    tpu.vector_store %arg5[%c0_46, %c271], %45 {strides = array<i32>} : memref<4x326xf32, #tpu.memory_space<vmem>>, vector<4x16xf32>,
    %c0_47 = arith.constant 0 : index
    %c0_48 = arith.constant 0 : index
    %c240 = arith.constant 240 : index
    %47 = vector.load %arg1[%c0_47, %c0_48, %c240] : memref<1x4x256xf32, #tpu.memory_space<vmem>>, vector<1x4x16xf32>
    %48 = vector.shape_cast %47 : vector<1x4x16xf32> to vector<4x16xf32>
    %c0_49 = arith.constant 0 : index
    %c289 = arith.constant 289 : index
    %49 = vector.load %arg5[%c0_49, %c289] : memref<4x326xf32, #tpu.memory_space<vmem>>, vector<4x16xf32>
    tpu.vector_store %arg5[%c0_49, %c289], %48 {strides = array<i32>} : memref<4x326xf32, #tpu.memory_space<vmem>>, vector<4x16xf32>,
    %cst_50 = arith.constant 0.000000e+00 : f32
    %50 = vector.broadcast %cst_50 : f32 to vector<5x288xf32>
    %c0_51 = arith.constant 0 : index
    %c0_52 = arith.constant 0 : index
    %51 = vector.load %arg2[%c0_51, %c0_52] : memref<5x36xf32, #tpu.memory_space<vmem>>, vector<5x4xf32>
    %c0_53 = arith.constant 0 : index
    %c0_54 = arith.constant 0 : index
    %52 = vector.load %arg5[%c0_53, %c0_54] : memref<4x326xf32, #tpu.memory_space<vmem>>, vector<4x288xf32>
    %cst_55 = arith.constant dense<0.000000e+00> : vector<5x288xf32>
    %53 = tpu.matmul %51, %52, %cst_55 {dimension_numbers = #tpu.dot_dimension_numbers<[1], [0], [0], [1], [0, 0, 1, 1], [], []>} : vector<5x4xf32>, vector<4x288xf32>, vector<5x288xf32> -> vector<5x288xf32>
    %54 = arith.addf %50, %53 : vector<5x288xf32>
    %c0_56 = arith.constant 0 : index
    %c4 = arith.constant 4 : index
    %55 = vector.load %arg2[%c0_56, %c4] : memref<5x36xf32, #tpu.memory_space<vmem>>, vector<5x4xf32>
    %c0_57 = arith.constant 0 : index
    %c1 = arith.constant 1 : index
    %56 = vector.load %arg5[%c0_57, %c1] : memref<4x326xf32, #tpu.memory_space<vmem>>, vector<4x288xf32>
    %cst_58 = arith.constant dense<0.000000e+00> : vector<5x288xf32>
    %57 = tpu.matmul %55, %56, %cst_58 {dimension_numbers = #tpu.dot_dimension_numbers<[1], [0], [0], [1], [0, 0, 1, 1], [], []>} : vector<5x4xf32>, vector<4x288xf32>, vector<5x288xf32> -> vector<5x288xf32>
    %58 = arith.addf %54, %57 : vector<5x288xf32>
    %c0_59 = arith.constant 0 : index
    %c8 = arith.constant 8 : index
    %59 = vector.load %arg2[%c0_59, %c8] : memref<5x36xf32, #tpu.memory_space<vmem>>, vector<5x4xf32>
    %c0_60 = arith.constant 0 : index
    %c2 = arith.constant 2 : index
    %60 = vector.load %arg5[%c0_60, %c2] : memref<4x326xf32, #tpu.memory_space<vmem>>, vector<4x288xf32>
    %cst_61 = arith.constant dense<0.000000e+00> : vector<5x288xf32>
    %61 = tpu.matmul %59, %60, %cst_61 {dimension_numbers = #tpu.dot_dimension_numbers<[1], [0], [0], [1], [0, 0, 1, 1], [], []>} : vector<5x4xf32>, vector<4x288xf32>, vector<5x288xf32> -> vector<5x288xf32>
    %62 = arith.addf %58, %61 : vector<5x288xf32>
    %c0_62 = arith.constant 0 : index
    %c12 = arith.constant 12 : index
    %63 = vector.load %arg2[%c0_62, %c12] : memref<5x36xf32, #tpu.memory_space<vmem>>, vector<5x4xf32>
    %c0_63 = arith.constant 0 : index
    %c18 = arith.constant 18 : index
    %64 = vector.load %arg5[%c0_63, %c18] : memref<4x326xf32, #tpu.memory_space<vmem>>, vector<4x288xf32>
    %cst_64 = arith.constant dense<0.000000e+00> : vector<5x288xf32>
    %65 = tpu.matmul %63, %64, %cst_64 {dimension_numbers = #tpu.dot_dimension_numbers<[1], [0], [0], [1], [0, 0, 1, 1], [], []>} : vector<5x4xf32>, vector<4x288xf32>, vector<5x288xf32> -> vector<5x288xf32>
    %66 = arith.addf %62, %65 : vector<5x288xf32>
    %c0_65 = arith.constant 0 : index
    %c16_66 = arith.constant 16 : index
    %67 = vector.load %arg2[%c0_65, %c16_66] : memref<5x36xf32, #tpu.memory_space<vmem>>, vector<5x4xf32>
    %c0_67 = arith.constant 0 : index
    %c19_68 = arith.constant 19 : index
    %68 = vector.load %arg5[%c0_67, %c19_68] : memref<4x326xf32, #tpu.memory_space<vmem>>, vector<4x288xf32>
    %cst_69 = arith.constant dense<0.000000e+00> : vector<5x288xf32>
    %69 = tpu.matmul %67, %68, %cst_69 {dimension_numbers = #tpu.dot_dimension_numbers<[1], [0], [0], [1], [0, 0, 1, 1], [], []>} : vector<5x4xf32>, vector<4x288xf32>, vector<5x288xf32> -> vector<5x288xf32>
    %70 = arith.addf %66, %69 : vector<5x288xf32>
    %c0_70 = arith.constant 0 : index
    %c20 = arith.constant 20 : index
    %71 = vector.load %arg2[%c0_70, %c20] : memref<5x36xf32, #tpu.memory_space<vmem>>, vector<5x4xf32>
    %c0_71 = arith.constant 0 : index
    %c20_72 = arith.constant 20 : index
    %72 = vector.load %arg5[%c0_71, %c20_72] : memref<4x326xf32, #tpu.memory_space<vmem>>, vector<4x288xf32>
    %cst_73 = arith.constant dense<0.000000e+00> : vector<5x288xf32>
    %73 = tpu.matmul %71, %72, %cst_73 {dimension_numbers = #tpu.dot_dimension_numbers<[1], [0], [0], [1], [0, 0, 1, 1], [], []>} : vector<5x4xf32>, vector<4x288xf32>, vector<5x288xf32> -> vector<5x288xf32>
    %74 = arith.addf %70, %73 : vector<5x288xf32>
    %c0_74 = arith.constant 0 : index
    %c24 = arith.constant 24 : index
    %75 = vector.load %arg2[%c0_74, %c24] : memref<5x36xf32, #tpu.memory_space<vmem>>, vector<5x4xf32>
    %c0_75 = arith.constant 0 : index
    %c36 = arith.constant 36 : index
    %76 = vector.load %arg5[%c0_75, %c36] : memref<4x326xf32, #tpu.memory_space<vmem>>, vector<4x288xf32>
    %cst_76 = arith.constant dense<0.000000e+00> : vector<5x288xf32>
    %77 = tpu.matmul %75, %76, %cst_76 {dimension_numbers = #tpu.dot_dimension_numbers<[1], [0], [0], [1], [0, 0, 1, 1], [], []>} : vector<5x4xf32>, vector<4x288xf32>, vector<5x288xf32> -> vector<5x288xf32>
    %78 = arith.addf %74, %77 : vector<5x288xf32>
    %c0_77 = arith.constant 0 : index
    %c28 = arith.constant 28 : index
    %79 = vector.load %arg2[%c0_77, %c28] : memref<5x36xf32, #tpu.memory_space<vmem>>, vector<5x4xf32>
    %c0_78 = arith.constant 0 : index
    %c37_79 = arith.constant 37 : index
    %80 = vector.load %arg5[%c0_78, %c37_79] : memref<4x326xf32, #tpu.memory_space<vmem>>, vector<4x288xf32>
    %cst_80 = arith.constant dense<0.000000e+00> : vector<5x288xf32>
    %81 = tpu.matmul %79, %80, %cst_80 {dimension_numbers = #tpu.dot_dimension_numbers<[1], [0], [0], [1], [0, 0, 1, 1], [], []>} : vector<5x4xf32>, vector<4x288xf32>, vector<5x288xf32> -> vector<5x288xf32>
    %82 = arith.addf %78, %81 : vector<5x288xf32>
    %c0_81 = arith.constant 0 : index
    %c32_82 = arith.constant 32 : index
    %83 = vector.load %arg2[%c0_81, %c32_82] : memref<5x36xf32, #tpu.memory_space<vmem>>, vector<5x4xf32>
    %c0_83 = arith.constant 0 : index
    %c38 = arith.constant 38 : index
    %84 = vector.load %arg5[%c0_83, %c38] : memref<4x326xf32, #tpu.memory_space<vmem>>, vector<4x288xf32>
    %cst_84 = arith.constant dense<0.000000e+00> : vector<5x288xf32>
    %85 = tpu.matmul %83, %84, %cst_84 {dimension_numbers = #tpu.dot_dimension_numbers<[1], [0], [0], [1], [0, 0, 1, 1], [], []>} : vector<5x4xf32>, vector<4x288xf32>, vector<5x288xf32> -> vector<5x288xf32>
    %86 = arith.addf %82, %85 : vector<5x288xf32>
    %c0_85 = arith.constant 0 : index
    %c0_86 = arith.constant 0 : index
    %87 = vector.load %arg3[%c0_85, %c0_86] : memref<5x1xf32, #tpu.memory_space<vmem>>, vector<5x1xf32>
    %88 = vector.broadcast %87 : vector<5x1xf32> to vector<5x288xf32>
    %89 = arith.addf %86, %88 : vector<5x288xf32>
    %c0_87 = arith.constant 0 : index
    %c0_88 = arith.constant 0 : index
    %c0_89 = arith.constant 0 : index
    %90 = vector.load %arg4[%c0_87, %c0_88, %c0_89] : memref<1x5x288xf32, #tpu.memory_space<vmem>>, vector<1x5x288xf32>
    %91 = vector.shape_cast %90 : vector<1x5x288xf32> to vector<5x288xf32>
    %92 = vector.shape_cast %89 : vector<5x288xf32> to vector<1x5x288xf32>
    tpu.vector_store %arg4[%c0_87, %c0_88, %c0_89], %92 {strides = array<i32>} : memref<1x5x288xf32, #tpu.memory_space<vmem>>, vector<1x5x288xf32>,
    return
  }
  func.func @transform_0(%arg0: i32) -> (i32, i32, i32) {
    %c0_i32 = arith.constant 0 : i32
    %c0_i32_0 = arith.constant 0 : i32
    %c0_i32_1 = arith.constant 0 : i32
    return %arg0, %c0_i32, %c0_i32_0 : i32, i32, i32
  }
  func.func @transform_1(%arg0: i32) -> (i32, i32) {
    %c0_i32 = arith.constant 0 : i32
    %c0_i32_0 = arith.constant 0 : i32
    %c0_i32_1 = arith.constant 0 : i32
    return %c0_i32, %c0_i32_0 : i32, i32
  }
  func.func @transform_2(%arg0: i32) -> (i32, i32) {
    %c0_i32 = arith.constant 0 : i32
    %c0_i32_0 = arith.constant 0 : i32
    %c0_i32_1 = arith.constant 0 : i32
    return %c0_i32, %c0_i32_0 : i32, i32
  }
  func.func @transform_3(%arg0: i32) -> (i32, i32, i32) {
    %c0_i32 = arith.constant 0 : i32
    %c0_i32_0 = arith.constant 0 : i32
    %c0_i32_1 = arith.constant 0 : i32
    return %arg0, %c0_i32, %c0_i32_0 : i32, i32, i32
  }
}

</mosaic_0001>

<bundles_post_ra>
// kernel: conv2d_pallas.1
= control target key start
LH: loop header
LB: loop body
LE: loop exit
PB: predicated region body
PF: predicated region fallthrough
CT: control target
= control target key end

     0   :  { %s2098_s12 = smov 0   ;;  %s2318_s0 = inlined_call_operand.vmem [shape: f32[2,4,256], index: 0, kind: input, shape index: {}]   ;;  %s2319_s1 = inlined_call_operand.vmem [shape: f32[5,36], index: 1, kind: input, shape index: {}]   ;;  %s2320_s2 = inlined_call_operand.vmem [shape: f32[5,1], index: 2, kind: input, shape index: {}]   ;;  %s2321_s3 = inlined_call_operand.vmem [shape: f32[2,5,288], index: 3, kind: output, shape index: {}]  }
   0x1 LB: > { %s1872_s13 = sadd.s32 4294967295, %s2042_s12   ;;  %p1876_p0 = scmp.ge.s32.totalorder %s2042_s12, 1  ;;  %s2042_s12 = sphi %s2098_s12, %s13_s12  }
   0x2   : > { %p137_p1 = scmp.lt.s32.totalorder %s2042_s12, 3 }
   0x4   : > { %p138_p2 = pnand %p1876_p0, %p137_p1 }
   0x5   : > { %p161_p3 = scmp.lt.s32.totalorder (!%p138_p2), %s1872_s13, 1  ;;  %s2045_s18 = smov (!%p138_p2), 23  }
   0x6   : > { %141 = sbr.rel (%p138_p2) target bundleno = 542 (0x21e), region = 32  ;;  %s2046_s19 = smov (!%p138_p2), 19  }
   0x7   : > { %s2047_s20 = smov (!%p138_p2), 25   ;;  %s2048_s21 = smov (!%p138_p2), 21  }
   0x8   : > { %s2049_s22 = smov (!%p138_p2), 27   ;;  %s2050_s23 = smov (!%p138_p2), 31  }
   0x9   : > { %s2051_s24 = smov (!%p138_p2), 33   ;;  %s2052_s25 = smov (!%p138_p2), 29  }
   0xa   : > { %s2053_s26 = smov (!%p138_p2), 37   ;;  %s2054_s27 = smov (!%p138_p2), 35  }
   0xb   : > { %v2044_v0 = vmov 0.0   ;;  %s2323_s13 = smov (!%p161_p3, %s1872_s13), 1  ;;  %vm172_vm0 = vcmask 568320   ;;  %s2055_s28 = smov 45   ;;  %v2137_v17 = vld [vmem:[%s2319_s1] sm:$0x1f] }
   0xc   : > { %171 = vst [vmem:[#allocation2] sm:$0xff] %v2044_v0  ;;  %1946 = vmatprep.subr.mxu1 %v2044_v0  ;;  %388 = vmatprep.mubr.f32.mxu0 %v2044_v0  ;;  %s1927_s14 = sshll.u32 %s2323_s13, 3  ;;  %173 = vst.msk [vmem:[#allocation2 + $0x8] sm:$0xf] %vm172_vm0, %v2044_v0  ;;  %s2056_s29 = smov 39   ;;  %vm179_vm1 = vcmask 281752  }
   0xd   : > { %s2115_s17 = scalar_lea.vmem %s2318_s0, %s1927_s14  ;;  %s2057_s30 = smov 41   ;;  %v614_v18 = vld [vmem:[%s2319_s1] sm:$0x1f]  ;;  %vm186_vm2 = vcmask 429352   ;;  %vm193_vm3 = vcmask 576952   ;;  %vm200_vm4 = vcmask 724552  }
   0xe   : > { %v188_v1 = vld [vmem:[%s2115_s17] sm:$0xf]  ;;  %v242_v9 = vld [vmem:[%s2115_s17 + $0x4] sm:$0xf]  ;;  %s2058_s4 = smov 43   ;;  %s2059_s5 = smov 47  }
   0xf   : > { %v174_v2 = vld [vmem:[%s2115_s17] sm:$0xf]  ;;  %190 = vrot.lane.b32.xlu1 %v188_v1, %s2045_s18  ;;  %v235_v10 = vld [vmem:[%s2115_s17 + $0x4] sm:$0xf]  ;;  %s2060_s6 = smov 49   ;;  %s2061_s9 = smov 124  }
  0x10   : > { %176 = vrot.lane.b32.xlu0 %v174_v2, %s2046_s19  ;;  %v195_v3 = vld [vmem:[%s2115_s17] sm:$0xf]  ;;  %v270_v11 = vld [vmem:[%s2115_s17 + $0x4] sm:$0xf]  ;;  %s2062_s14 = smov 120   ;;  %vm207_vm5 = vcmask 872152  }
  0x11   : > { %v181_v4 = vld [vmem:[%s2115_s17] sm:$0xf]  ;;  %v249_v12 = vld [vmem:[%s2115_s17 + $0x4] sm:$0xf]  ;;  %vm224_vm6 = vcmask 1044472   ;;  %vm225_vm7 = vcmask 121860  }
  0x12   : > { %v202_v5 = vld [vmem:[%s2115_s17] sm:$0xf]  ;;  %v256_v13 = vld [vmem:[%s2115_s17 + $0x4] sm:$0xf]  ;;  %vm221_vm8 = vcmask 252928   ;;  %vm214_vm9 = vcmask 1019752   ;;  %vm226_vm10 = vmor %vm225_vm7, %vm224_vm6 }
  0x13   : > { %197 = vrot.lane.b32.xlu1 %v195_v3, %s2047_s20  ;;  %v216_v6 = vld [vmem:[%s2115_s17] sm:$0xf]  ;;  %v263_v14 = vld [vmem:[%s2115_s17 + $0x4] sm:$0xf]  ;;  %s2064_s20 = smov 112   ;;  %vm233_vm11 = vcmask 265352  }
  0x14   : > { %183 = vrot.lane.b32.xlu0 %v181_v4, %s2048_s21  ;;  %v228_v7 = vld [vmem:[%s2115_s17] sm:$0xf]  ;;  %v282_v15 = vld [vmem:[%s2115_s17 + $0x4] sm:$0xf]  ;;  %vm240_vm12 = vcmask 412952   ;;  %vm247_vm13 = vcmask 560552  }
  0x15   : > { %v209_v8 = vld [vmem:[%s2115_s17] sm:$0xf]  ;;  %v289_v16 = vld [vmem:[%s2115_s17 + $0x4] sm:$0xf]  ;;  %s2063_s17 = smov 116   ;;  %vm254_vm14 = vcmask 708152  }
  0x16   : > { %v784_v19 = vld [vmem:[%s2319_s1] sm:$0x1f]  ;;  %vm278_vm15 = vcmask 1044456   ;;  %vm279_vm0 = vcmask 105476   ;;  %vm287_vm6 = vcmask 248952   ;;  %vm294_vm7 = vcmask 396552  }
  0x17   : > { %204 = vrot.lane.b32.xlu1 %v202_v5, %s2049_s22  ;;  %v954_v20 = vld [vmem:[%s2319_s1] sm:$0x1f]  ;;  %s2073_s7 = smov 92   ;;  %s2074_s8 = smov 91   ;;  %v2077_v55 = vmov 0  }
  0x18   : > { %218 = vrot.lane.b32.xlu0 %v216_v6, %s2050_s23  ;;  %v1124_v21 = vld [vmem:[%s2319_s1] sm:$0x1f]  ;;  %s2065_s23 = smov 108  }
  0x19   : > { %v1294_v22 = vld [vmem:[%s2319_s1] sm:$0x1f]  ;;  %2034 = vset.pattern.permute.xlu0 %v2077_v55 }
  0x1a   : > { %v1464_v45 = vld [vmem:[%s2319_s1] sm:$0x1f] }
  0x1b   : > { %230 = vrot.lane.b32.xlu1 %v228_v7, %s2051_s24  ;;  %v1634_v54 = vld [vmem:[%s2319_s1] sm:$0x1f] }
  0x1c   : > { %211 = vrot.lane.b32.xlu0 %v209_v8, %s2052_s25  ;;  %v1804_v56 = vld [vmem:[%s2320_s2] sm:$0x1f] }
  0x1f   : > { %244 = vrot.lane.b32.xlu1 %v242_v9, %s2053_s26  ;;  %s2066_s26 = smov 104  }
  0x20   : > { %237 = vrot.lane.b32.xlu0 %v235_v10, %s2054_s27  ;;  %s2068_s27 = smov 127  }
  0x23   : > { %272 = vrot.lane.b32.xlu1 %v270_v11, %s2055_s28  ;;  %s2069_s28 = smov 126  }
  0x24   : > { %251 = vrot.lane.b32.xlu0 %v249_v12, %s2056_s29 }
  0x27   : > { %265 = vrot.lane.b32.xlu1 %v263_v14, %s2058_s4  ;;  %s2070_s4 = smov 100  }
  0x28   : > { %258 = vrot.lane.b32.xlu0 %v256_v13, %s2057_s30 }
  0x2b   : > { %291 = vrot.lane.b32.xlu1 %v289_v16, %s2060_s6  ;;  %s2072_s6 = smov 109  }
  0x2c   : > { %284 = vrot.lane.b32.xlu0 %v282_v15, %s2059_s5  ;;  %s2071_s5 = smov 110  }
  0x2f   : > { %300 = vrot.lane.b32.xlu1 %v2137_v17, %s2061_s9  ;;  %s2075_s9 = smov 90  }
  0x33   : > { %618 = vrot.lane.b32.xlu1 %v614_v18, %s2062_s14  ;;  %s2076_s14 = smov 96  }
  0x37   : > { %788 = vrot.lane.b32.xlu1 %v784_v19, %s2063_s17  ;;  %s1991_s17 = smul.u32 24, %s2323_s13 }
  0x3b   : > { %958 = vrot.lane.b32.xlu1 %v954_v20, %s2064_s20  ;;  %s2310_s20 = scalar_lea.vmem %s2321_s3, %s1991_s17 }
  0x3f   : > { %1128 = vrot.lane.b32.xlu1 %v1124_v21, %s2065_s23 }
  0x43   : > { %1298 = vrot.lane.b32.xlu1 %v1294_v22, %s2066_s26 }
  0x81   : > { %v191_v23 = vpop.permute.xlu1 %190 }
  0x82   : > { %v177_v24 = vpop.permute.xlu0 %176 }
  0x83   : > { %180 = vst.msk [vmem:[#allocation2] sm:$0xf] %vm179_vm1, %v177_v24  ;;  %vm261_vm1 = vcmask 855752  }
  0x85   : > { %v198_v25 = vpop.permute.xlu1 %197 }
  0x86   : > { %v184_v26 = vpop.permute.xlu0 %183 }
  0x87   : > { %187 = vst.msk [vmem:[#allocation2] sm:$0xf] %vm186_vm2, %v184_v26  ;;  %vm275_vm2 = vcmask 367616  }
  0x88   : > { %194 = vst.msk [vmem:[#allocation2] sm:$0xf] %vm193_vm3, %v191_v23  ;;  %vm268_vm3 = vcmask 1003352  }
  0x89   : > { %201 = vst.msk [vmem:[#allocation2] sm:$0xf] %vm200_vm4, %v198_v25  ;;  %v205_v27 = vpop.permute.xlu1 %204  ;;  %vm280_vm4 = vmor %vm279_vm0, %vm278_vm15  ;;  %vm1309_vm15 = vcmask 752640   ;;  %vm1479_vm0 = vcmask 744448  }
  0x8a   : > { %v219_v28 = vpop.permute.xlu0 %218  ;;  %208 = vst.msk [vmem:[#allocation2] sm:$0xf] %vm207_vm5, %v205_v27  ;;  %vm2067_vm5 = vmmov 0  }
  0x8b   : > { %v220_v29 = vrot.slane %v219_v28, 4  ;;  %1948 = vmatprep.mubr.msk.f32.mxu1 %vm2067_vm5, %v2044_v0 }
  0x8d   : > { %v231_v30 = vpop.permute.xlu1 %230  ;;  %v222_v32 = vsel %vm221_vm8, %v220_v29, %v219_v28  ;;  %vm317_vm8 = vcmask 1043456  }
  0x8e   : > { %v212_v31 = vpop.permute.xlu0 %211 }
  0x8f   : > { %215 = vst.msk [vmem:[#allocation2] sm:$0xf] %vm214_vm9, %v212_v31  ;;  %vm314_vm9 = vcmask 31744  }
  0x90   : > { %227 = vst.msk [vmem:[#allocation2] sm:$0xff] %vm226_vm10, %v222_v32  ;;  %vm311_vm10 = vcmask 1039360  }
  0x91   : > { %234 = vst.msk [vmem:[#allocation2 + $0x4] sm:$0xf] %vm233_vm11, %v231_v30  ;;  %v245_v33 = vpop.permute.xlu1 %244  ;;  %vm629_vm11 = vcmask 1031168  }
  0x92   : > { %v238_v34 = vpop.permute.xlu0 %237 }
  0x93   : > { %241 = vst.msk [vmem:[#allocation2 + $0x4] sm:$0xf] %vm240_vm12, %v238_v34  ;;  %vm799_vm12 = vcmask 900096  }
  0x94   : > { %248 = vst.msk [vmem:[#allocation2 + $0x4] sm:$0xf] %vm247_vm13, %v245_v33  ;;  %vm969_vm13 = vcmask 891904  }
  0x95   : > { %v273_v35 = vpop.permute.xlu1 %272 }
  0x96   : > { %v252_v36 = vpop.permute.xlu0 %251  ;;  %v274_v37 = vrot.slane %v273_v35, 4 }
  0x97   : > { %255 = vst.msk [vmem:[#allocation2 + $0x4] sm:$0xf] %vm254_vm14, %v252_v36  ;;  %vm1139_vm14 = vcmask 883712  }
  0x98   : > { %v276_v40 = vsel %vm275_vm2, %v274_v37, %v273_v35  ;;  %vm1815_vm2 = vcmask 258048  }
  0x99   : > { %v266_v39 = vpop.permute.xlu1 %265 }
  0x9a   : > { %v259_v38 = vpop.permute.xlu0 %258 }
  0x9b   : > { %262 = vst.msk [vmem:[#allocation2 + $0x4] sm:$0xf] %vm261_vm1, %v259_v38  ;;  %vm1649_vm1 = vcmask 736256  }
  0x9c   : > { %269 = vst.msk [vmem:[#allocation2 + $0x4] sm:$0xf] %vm268_vm3, %v266_v39 }
  0x9d   : > { %281 = vst.msk [vmem:[#allocation2 + $0x4] sm:$0xff] %vm280_vm4, %v276_v40  ;;  %v292_v42 = vpop.permute.xlu1 %291 }
  0x9e   : > { %v285_v41 = vpop.permute.xlu0 %284 }
  0x9f   : > { %288 = vst.msk [vmem:[#allocation2 + $0x8] sm:$0xf] %vm287_vm6, %v285_v41 }
  0xa0   : > { %295 = vst.msk [vmem:[#allocation2 + $0x8] sm:$0xf] %vm294_vm7, %v292_v42 }
  0xa1   : > { %v301_v57 = vpop.permute.xlu1 %300 }
  0xa4   : > { %v2158_v43 = vld [vmem:[#allocation2] sm:$0xff] }
  0xa5   : > { %305 = vrot.lane.b32.xlu0 %v2158_v43, %s2068_s27  ;;  %v2172_v50 = vcombine.high %v2158_v43, %v2158_v43  ;;  %v2192_v58 = vpop.permute.xlu1 %618 }
  0xa7   : > { %v298_v44 = vld [vmem:[#allocation2 + $0x8] sm:$0xf] }
  0xa8   : > { %309 = vrot.lane.b32.xlu1 %v298_v44, %s2068_s27  ;;  %v616_v46 = vld [vmem:[#allocation2 + $0x8] sm:$0xf] }
  0xa9   : > { %623 = vrot.lane.b32.xlu0 %v2158_v43, %s2069_s28  ;;  %v786_v47 = vld [vmem:[#allocation2 + $0x8] sm:$0xf]  ;;  %v2194_v59 = vpop.permute.xlu1 %788 }
  0xaa   : > { %v956_v48 = vld [vmem:[#allocation2 + $0x8] sm:$0xf] }
  0xab   : > { %v1126_v49 = vld [vmem:[#allocation2 + $0x8] sm:$0xf] }
  0xac   : > { %1468 = vrot.lane.b32.xlu1 %v1464_v45, %s2070_s4  ;;  %v1296_v51 = vld [vmem:[#allocation2 + $0x8] sm:$0xf] }
  0xad   : > { %793 = vrot.lane.b32.xlu0 %v2158_v43, %s2071_s5  ;;  %v1466_v52 = vld [vmem:[#allocation2 + $0x8] sm:$0xf]  ;;  %v2196_v60 = vpop.permute.xlu1 %958 }
  0xae   : > { %v1636_v53 = vld [vmem:[#allocation2 + $0x8] sm:$0xf] }
  0xb0   : > { %627 = vrot.lane.b32.xlu1 %v616_v46, %s2069_s28 }
  0xb1   : > { %963 = vrot.lane.b32.xlu0 %v2158_v43, %s2072_s6  ;;  %v2198_v61 = vpop.permute.xlu1 %1128 }
  0xb4   : > { %797 = vrot.lane.b32.xlu1 %v786_v47, %s2071_s5 }
  0xb5   : > { %1133 = vrot.lane.b32.xlu0 %v2158_v43, %s2065_s23  ;;  %v2200_v62 = vpop.permute.xlu1 %1298 }
  0xb8   : > { %967 = vrot.lane.b32.xlu1 %v956_v48, %s2072_s6 }
  0xb9   : > { %1303 = vrot.lane.b32.xlu0 %v2158_v43, %s2073_s7 }
  0xbc   : > { %1137 = vrot.lane.b32.xlu1 %v1126_v49, %s2065_s23 }
  0xbd   : > { %307 = vrot.lane.b32.xlu0 %v2172_v50, %s2068_s27 }
  0xc0   : > { %1307 = vrot.lane.b32.xlu1 %v1296_v51, %s2073_s7 }
  0xc1   : > { %1473 = vrot.lane.b32.xlu0 %v2158_v43, %s2074_s8 }
  0xc4   : > { %1477 = vrot.lane.b32.xlu1 %v1466_v52, %s2074_s8 }
  0xc5   : > { %625 = vrot.lane.b32.xlu0 %v2172_v50, %s2069_s28 }
  0xc8   : > { %1647 = vrot.lane.b32.xlu1 %v1636_v53, %s2075_s9 }
  0xc9   : > { %795 = vrot.lane.b32.xlu0 %v2172_v50, %s2071_s5 }
  0xcc   : > { %1638 = vrot.lane.b32.xlu1 %v1634_v54, %s2076_s14 }
  0xcd   : > { %965 = vrot.lane.b32.xlu0 %v2172_v50, %s2072_s6 }
  0xd1   : > { %1135 = vrot.lane.b32.xlu0 %v2172_v50, %s2065_s23 }
  0xd5   : > { %1305 = vrot.lane.b32.xlu0 %v2172_v50, %s2073_s7 }
  0xd9   : > { %1475 = vrot.lane.b32.xlu0 %v2172_v50, %s2074_s8 }
  0xdd   : > { %1645 = vrot.lane.b32.xlu0 %v2172_v50, %s2075_s9 }
  0xe1   : > { %1643 = vrot.lane.b32.xlu0 %v2158_v43, %s2075_s9 }
  0xe5   : > { %1807 = vperm.xlu0 %2034, %v1804_v56  }
 0x117   : > { %v306_v63 = vpop.permute.xlu0 %305 }
 0x11a   : > { %v310_v1 = vpop.permute.xlu1 %309 }
 0x11b   : > { %1947 = vmatpush3.msk.msra.mxu1 %vm317_vm8, %v310_v1  ;;  %v624_v2 = vpop.permute.xlu0 %623 }
 0x11c   : > { %1949 = vmatmul.mubr.msk.f32.vlgmr.msra.gmra.mxu1 %vm314_vm9, %v301_v57  ;;  %1951 = vmatprep.subr.mxu1 %v2044_v0 }
 0x11d   : > { %1952 = vmatpush3.msk.msra.mxu1 %vm317_vm8, %v298_v44  ;;  %1953 = vmatprep.mubr.msk.f32.mxu1 %vm2067_vm5, %v2044_v0 }
 0x11e   : > { %v2208_v3 = vpop.permute.xlu1 %1468  ;;  %1956 = vmatprep.subr.mxu1 %v2044_v0 }
 0x11f   : > { %v794_v4 = vpop.permute.xlu0 %793 }
 0x120   : > { %1954 = vmatmul.mubr.msk.f32.vlgmr.msra.gmra.mxu1 %vm314_vm9, %v2137_v17 }
 0x121   : > { %1958 = vmatprep.mubr.msk.f32.mxu1 %vm2067_vm5, %v2044_v0 }
 0x122   : > { %v628_v5 = vpop.permute.xlu1 %627 }
 0x123   : > { %1957 = vmatpush3.msk.msra.mxu1 %vm317_vm8, %v628_v5  ;;  %v2216_v6 = vpop.permute.xlu0 %963 }
 0x124   : > { %1959 = vmatmul.mubr.msk.f32.vlgmr.msra.gmra.mxu1 %vm314_vm9, %v2192_v58  ;;  %1961 = vmatprep.subr.mxu1 %v2044_v0 }
 0x125   : > { %1963 = vmatprep.mubr.msk.f32.mxu1 %vm2067_vm5, %v2044_v0 }
 0x126   : > { %v798_v7 = vpop.permute.xlu1 %797 }
 0x127   : > { %1962 = vmatpush3.msk.msra.mxu1 %vm317_vm8, %v798_v7  ;;  %v2224_v8 = vpop.permute.xlu0 %1133 }
 0x128   : > { %1964 = vmatmul.mubr.msk.f32.vlgmr.msra.gmra.mxu1 %vm314_vm9, %v2194_v59  ;;  %1966 = vmatprep.subr.mxu1 %v2044_v0 }
 0x129   : > { %1968 = vmatprep.mubr.msk.f32.mxu1 %vm2067_vm5, %v2044_v0 }
 0x12a   : > { %v968_v9 = vpop.permute.xlu1 %967 }
 0x12b   : > { %1967 = vmatpush3.msk.msra.mxu1 %vm317_vm8, %v968_v9  ;;  %v2232_v10 = vpop.permute.xlu0 %1303 }
 0x12c   : > { %1969 = vmatmul.mubr.msk.f32.vlgmr.msra.gmra.mxu1 %vm314_vm9, %v2196_v60  ;;  %1971 = vmatprep.subr.mxu1 %v2044_v0 }
 0x12d   : > { %1973 = vmatprep.mubr.msk.f32.mxu1 %vm2067_vm5, %v2044_v0 }
 0x12e   : > { %v1138_v11 = vpop.permute.xlu1 %1137 }
 0x12f   : > { %1972 = vmatpush3.msk.msra.mxu1 %vm317_vm8, %v1138_v11  ;;  %v308_v12 = vpop.permute.xlu0 %307 }
 0x130   : > { %1974 = vmatmul.mubr.msk.f32.vlgmr.msra.gmra.mxu1 %vm314_vm9, %v2198_v61  ;;  %v313_v13 = vsel %vm311_vm10, %v308_v12, %v310_v1  ;;  %1976 = vmatprep.subr.mxu1 %v2044_v0  ;;  %v312_v14 = vsel %vm311_vm10, %v306_v63, %v308_v12 }
 0x131   : > { %1880 = vmatprep.subr.msk.mxu0 %vm317_vm8, %v313_v13  ;;  %1978 = vmatprep.mubr.msk.f32.mxu1 %vm2067_vm5, %v2044_v0 }
 0x132   : > { %v1308_v15 = vpop.permute.xlu1 %1307  ;;  %1881 = vmatpush1.msk.msra.mxu0 %vm317_vm8, %v312_v14 }
 0x133   : > { %1882 = vmatmul.mubr.msk.f32.vlgmr.msra.gmra.mxu0 %vm314_vm9, %v301_v57  ;;  %1885 = vmatprep.subr.msk.mxu0 %vm317_vm8, %v2172_v50  ;;  %v1474_v16 = vpop.permute.xlu0 %1473 }
 0x134   : > { %1977 = vmatpush3.msk.msra.mxu1 %vm317_vm8, %v1308_v15  ;;  %1886 = vmatpush1.msk.msra.mxu0 %vm317_vm8, %v2158_v43 }
 0x135   : > { %1979 = vmatmul.mubr.msk.f32.vlgmr.msra.gmra.mxu1 %vm314_vm9, %v2200_v62  ;;  %1981 = vmatprep.subr.mxu1 %v2044_v0 }
 0x136   : > { %v1478_v18 = vpop.permute.xlu1 %1477  ;;  %537 = vmatprep.mubr.f32.mxu0 %v2044_v0  ;;  %1983 = vmatprep.mubr.msk.f32.mxu1 %vm2067_vm5, %v2044_v0 }
 0x137   : > { %1887 = vmatmul.mubr.msk.f32.vlgmr.msra.gmra.mxu0 %vm314_vm9, %v2137_v17  ;;  %1982 = vmatpush3.msk.msra.mxu1 %vm317_vm8, %v1478_v18  ;;  %v626_v19 = vpop.permute.xlu0 %625 }
 0x138   : > { %v630_v20 = vsel %vm629_vm11, %v624_v2, %v626_v19  ;;  %v631_v21 = vsel %vm629_vm11, %v626_v19, %v628_v5  ;;  %1986 = vmatprep.subr.mxu1 %v2044_v0  ;;  %704 = vmatprep.mubr.f32.mxu0 %v2044_v0 }
 0x139   : > { %1984 = vmatmul.mubr.msk.f32.vlgmr.msra.gmra.mxu1 %vm314_vm9, %v2208_v3  ;;  %1890 = vmatprep.subr.msk.mxu0 %vm317_vm8, %v631_v21 }
 0x13a   : > { %v1648_v22 = vpop.permute.xlu1 %1647  ;;  %1891 = vmatpush1.msk.msra.mxu0 %vm317_vm8, %v630_v20  ;;  %1988 = vmatprep.mubr.msk.f32.mxu1 %vm2067_vm5, %v2044_v0 }
 0x13b   : > { %1892 = vmatmul.mubr.msk.f32.vlgmr.msra.gmra.mxu0 %vm314_vm9, %v2192_v58  ;;  %1987 = vmatpush3.msk.msra.mxu1 %vm317_vm8, %v1648_v22  ;;  %v796_v17 = vpop.permute.xlu0 %795 }
 0x13c   : > { %v800_v23 = vsel %vm799_vm12, %v794_v4, %v796_v17  ;;  %v801_v24 = vsel %vm799_vm12, %v796_v17, %v798_v7  ;;  %874 = vmatprep.mubr.f32.mxu0 %v2044_v0 }
 0x13d   : > { %1895 = vmatprep.subr.msk.mxu0 %vm317_vm8, %v801_v24 }
 0x13e   : > { %v1639_v25 = vpop.permute.xlu1 %1638  ;;  %1896 = vmatpush1.msk.msra.mxu0 %vm317_vm8, %v800_v23 }
 0x13f   : > { %1897 = vmatmul.mubr.msk.f32.vlgmr.msra.gmra.mxu0 %vm314_vm9, %v2194_v59  ;;  %1989 = vmatmul.mubr.msk.f32.vlgmr.msra.gmra.mxu1 %vm314_vm9, %v1639_v25  ;;  %v966_v26 = vpop.permute.xlu0 %965 }
 0x140   : > { %v970_v27 = vsel %vm969_vm13, %v2216_v6, %v966_v26  ;;  %v971_v28 = vsel %vm969_vm13, %v966_v26, %v968_v9  ;;  %1044 = vmatprep.mubr.f32.mxu0 %v2044_v0 }
 0x141   : > { %1900 = vmatprep.subr.msk.mxu0 %vm317_vm8, %v971_v28 }
 0x142   : > { %1901 = vmatpush1.msk.msra.mxu0 %vm317_vm8, %v970_v27 }
 0x143   : > { %1902 = vmatmul.mubr.msk.f32.vlgmr.msra.gmra.mxu0 %vm314_vm9, %v2196_v60  ;;  %v1136_v29 = vpop.permute.xlu0 %1135 }
 0x144   : > { %v1140_v30 = vsel %vm1139_vm14, %v2224_v8, %v1136_v29  ;;  %v1141_v31 = vsel %vm1139_vm14, %v1136_v29, %v1138_v11  ;;  %1214 = vmatprep.mubr.f32.mxu0 %v2044_v0 }
 0x145   : > { %1905 = vmatprep.subr.msk.mxu0 %vm317_vm8, %v1141_v31 }
 0x146   : > { %1906 = vmatpush1.msk.msra.mxu0 %vm317_vm8, %v1140_v30 }
 0x147   : > { %1907 = vmatmul.mubr.msk.f32.vlgmr.msra.gmra.mxu0 %vm314_vm9, %v2198_v61  ;;  %v1306_v32 = vpop.permute.xlu0 %1305 }
 0x148   : > { %v1310_v33 = vsel %vm1309_vm15, %v2232_v10, %v1306_v32  ;;  %v1311_v34 = vsel %vm1309_vm15, %v1306_v32, %v1308_v15  ;;  %1384 = vmatprep.mubr.f32.mxu0 %v2044_v0 }
 0x149   : > { %1910 = vmatprep.subr.msk.mxu0 %vm317_vm8, %v1311_v34 }
 0x14a   : > { %1911 = vmatpush1.msk.msra.mxu0 %vm317_vm8, %v1310_v33 }
 0x14b   : > { %1912 = vmatmul.mubr.msk.f32.vlgmr.msra.gmra.mxu0 %vm314_vm9, %v2200_v62  ;;  %v1476_v35 = vpop.permute.xlu0 %1475 }
 0x14c   : > { %v1480_v36 = vsel %vm1479_vm0, %v1474_v16, %v1476_v35  ;;  %v1481_v37 = vsel %vm1479_vm0, %v1476_v35, %v1478_v18  ;;  %1554 = vmatprep.mubr.f32.mxu0 %v2044_v0 }
 0x14d   : > { %1915 = vmatprep.subr.msk.mxu0 %vm317_vm8, %v1481_v37 }
 0x14e   : > { %1916 = vmatpush1.msk.msra.mxu0 %vm317_vm8, %v1480_v36 }
 0x14f   : > { %1917 = vmatmul.mubr.msk.f32.vlgmr.msra.gmra.mxu0 %vm314_vm9, %v2208_v3  ;;  %v1646_v38 = vpop.permute.xlu0 %1645 }
 0x150   : > { %v1651_v39 = vsel %vm1649_vm1, %v1646_v38, %v1648_v22  ;;  %1724 = vmatprep.mubr.f32.mxu0 %v2044_v0 }
 0x151   : > { %1920 = vmatprep.subr.msk.mxu0 %vm317_vm8, %v1651_v39 }
 0x153   : > { %v1644_v40 = vpop.permute.xlu0 %1643 }
 0x154   : > { %v1650_v41 = vsel %vm1649_vm1, %v1644_v40, %v1646_v38 }
 0x155   : > { %1921 = vmatpush1.msk.msra.mxu0 %vm317_vm8, %v1650_v41 }
 0x156   : > { %1922 = vmatmul.mubr.msk.f32.vlgmr.msra.gmra.mxu0 %vm314_vm9, %v1639_v25 }
 0x160   : > { %v1808_v7 = vpop.permute.xlu0 %1807 }
 0x1dc   : > { %v461_v42 = vpop.f32.mrf.mxu1 }
 0x1de   : > { %v1950_v43 = vpop.f32.mrf.mxu1 }
 0x1e0   : > { %v610_v44 = vpop.f32.mrf.mxu1 }
 0x1e1   : > { %v611_v0 = vadd.f32 %v610_v44, %v461_v42 }
 0x1e2   : > { %v1955_v45 = vpop.f32.mrf.mxu1 }
 0x1e4   : > { %v777_v46 = vpop.f32.mrf.mxu1 }
 0x1e5   : > { %v783_v55 = vadd.f32 %v777_v46, %v611_v0 }
 0x1e6   : > { %v1960_v47 = vpop.f32.mrf.mxu1 }
 0x1e8   : > { %v947_v48 = vpop.f32.mrf.mxu1 }
 0x1e9   : > { %v953_v58 = vadd.f32 %v947_v48, %v783_v55 }
 0x1ea   : > { %v1965_v49 = vpop.f32.mrf.mxu1 }
 0x1ec   : > { %v1117_v50 = vpop.f32.mrf.mxu1 }
 0x1ed   : > { %v1123_v61 = vadd.f32 %v1117_v50, %v953_v58 }
 0x1ee   : > { %v1970_v51 = vpop.f32.mrf.mxu1 }
 0x1f0   : > { %v1287_v52 = vpop.f32.mrf.mxu1 }
 0x1f1   : > { %v1293_v1 = vadd.f32 %v1287_v52, %v1123_v61 }
 0x1f2   : > { %v1975_v53 = vpop.f32.mrf.mxu1 }
 0x1f3   : > { %v390_v54 = vpop.f32.mrf.mxu0 }
 0x1f5   : > { %v1457_v56 = vpop.f32.mrf.mxu1  ;;  %v392_v57 = vpop.f32.mrf.mxu0 }
 0x1f6   : > { %v1463_v4 = vadd.f32 %v1457_v56, %v1293_v1 }
 0x1f7   : > { %v1980_v59 = vpop.f32.mrf.mxu1  ;;  %v539_v60 = vpop.f32.mrf.mxu0 }
 0x1f8   : > { %v540_v18 = vadd.f32 %v539_v60, %v390_v54 }
 0x1f9   : > { %v1627_v62 = vpop.f32.mrf.mxu1  ;;  %v541_v63 = vpop.f32.mrf.mxu0 }
 0x1fa   : > { %v1633_v6 = vadd.f32 %v1627_v62, %v1463_v4  ;;  %v542_v20 = vadd.f32 %v541_v63, %v392_v57 }
 0x1fb   : > { %v1985_v2 = vpop.f32.mrf.mxu1  ;;  %v706_v3 = vpop.f32.mrf.mxu0 }
 0x1fc   : > { %v781_v21 = vadd.f32 %v706_v3, %v540_v18 }
 0x1fd   : > { %v708_v5 = vpop.f32.mrf.mxu0 }
 0x1fe   : > { %v782_v17 = vadd.f32 %v708_v5, %v542_v20 }
 0x1ff   : > { %v876_v8 = vpop.f32.mrf.mxu0  ;;  %v1797_v9 = vpop.f32.mrf.mxu1 }
 0x200   : > { %v1803_v10 = vadd.f32 %v1797_v9, %v1633_v6  ;;  %v951_v23 = vadd.f32 %v876_v8, %v781_v21 }
 0x201   : > { %v878_v11 = vpop.f32.mrf.mxu0  ;;  %v1990_v12 = vpop.f32.mrf.mxu1 }
 0x202   : > { %v1812_v13 = vadd.f32 %v1808_v7, %v1803_v10  ;;  %v952_v25 = vadd.f32 %v878_v11, %v782_v17 }
 0x203   : > { %v1046_v14 = vpop.f32.mrf.mxu0 }
 0x204   : > { %1816 = vst.msk [vmem:[%s2310_s20 + $0x10] sm:$0x1f] %vm1815_vm2, %v1812_v13  ;;  %v1121_v26 = vadd.f32 %v1046_v14, %v951_v23 }
 0x205   : > { %v1048_v15 = vpop.f32.mrf.mxu0 }
 0x206   : > { %v1122_v28 = vadd.f32 %v1048_v15, %v952_v25 }
 0x207   : > { %v1216_v16 = vpop.f32.mrf.mxu0 }
 0x208   : > { %v1291_v29 = vadd.f32 %v1216_v16, %v1121_v26 }
 0x209   : > { %v1218_v19 = vpop.f32.mrf.mxu0 }
 0x20a   : > { %v1292_v30 = vadd.f32 %v1218_v19, %v1122_v28 }
 0x20b   : > { %v1386_v22 = vpop.f32.mrf.mxu0 }
 0x20c   : > { %v1461_v31 = vadd.f32 %v1386_v22, %v1291_v29 }
 0x20d   : > { %v1388_v24 = vpop.f32.mrf.mxu0 }
 0x20e   : > { %v1462_v33 = vadd.f32 %v1388_v24, %v1292_v30 }
 0x20f   : > { %v1556_v27 = vpop.f32.mrf.mxu0 }
 0x210   : > { %v1631_v34 = vadd.f32 %v1556_v27, %v1461_v31 }
 0x211   : > { %v1558_v32 = vpop.f32.mrf.mxu0 }
 0x212   : > { %v1632_v36 = vadd.f32 %v1558_v32, %v1462_v33 }
 0x216   : > { %v1726_v35 = vpop.f32.mrf.mxu0 }
 0x217   : > { %v1801_v37 = vadd.f32 %v1726_v35, %v1631_v34 }
 0x218   : > { %v1728_v38 = vpop.f32.mrf.mxu0 }
 0x219   : > { %v1810_v39 = vadd.f32 %v1808_v7, %v1801_v37  ;;  %v1802_v40 = vadd.f32 %v1728_v38, %v1632_v36 }
 0x21b   : > { %1813 = vst [vmem:[%s2310_s20] sm:$0x1f] %v1810_v39  ;;  %v1811_v41 = vadd.f32 %v1808_v7, %v1802_v40 }
 0x21d   : > { %1814 = vst [vmem:[%s2310_s20 + $0x8] sm:$0x1f] %v1811_v41 }
 0x21e PF: > { %s13_s12 = sadd.s32 1, %s2042_s12  }
 0x21f   : > { %p10_p4 = scmp.ge.s32.totalorder %s13_s12, 4  }
 0x221   :  { %12 = sbr.rel (!%p10_p4) target bundleno = 1 (0x1), region = 62 }

</bundles_post_ra>
